<compile_context>
chip_gen: v7x
topology: tpu7x:2x2x1
jax: 0.10.0
libtpu: 0.0.40
codegen_flags: <defaults>
</compile_context>

<pallas_src>
import functools

import jax
import jax.numpy as jnp
import numpy as np
from jax.experimental import pallas as pl
from jax.experimental.pallas import tpu as pltpu

EPS = 1e-5  # PyTorch default eps for BatchNorm2d and GroupNorm


# ----------------------------- kernel helpers -----------------------------

def _gn_relu(x, gamma, beta, inv_n):
    """GroupNorm(num_groups=1) + affine + ReLU, single-pass stats.

    `x` may carry zero-padded channel rows; `inv_n` is 1/(real_C * HW) so the
    zero rows do not perturb the statistics, and zero gamma/beta keep the
    padded rows exactly zero on output.
    """
    s = jnp.sum(x)
    ss = jnp.sum(x * x)
    mu = s * inv_n
    var = jnp.maximum(ss * inv_n - mu * mu, 0.0)
    xn = (x - mu) * jax.lax.rsqrt(var + EPS)
    return jnp.maximum(xn * gamma + beta, 0.0)


def _conv3x3_fused(x, w_fused, b, shifts, masks):
    """3x3 conv (padding=1) as ONE matmul on channel-major flattened data.

    x:        (Cp, HW)       padded-channel activations
    w_fused:  (Coutp, 9*Cp)  tap-major packed weights
    b:        (Coutp, 1)
    shifts:   list of 9 static roll amounts (shift 0 == center tap)
    masks:    (>=9, HW) f32 boundary-validity rows (precomputed on host)
    """
    parts = []
    for k in range(9):
        shifted = x if shifts[k] == 0 else pltpu.roll(x, shifts[k], axis=1)
        if k == 4:                       # center tap: fully valid, no mask
            parts.append(shifted)
        else:
            parts.append(shifted * masks[k:k + 1, :])
    stacked = jnp.concatenate(parts, axis=0)          # (9*Cp, HW)
    return jnp.dot(w_fused, stacked, preferred_element_type=jnp.float32) + b


# --------------------------------- kernel ---------------------------------

def csff_kernel(fin_ref, fout_ref, w1x1_ref, w3x3_ref, vec_ref, msk_ref, o_ref,
                *, H, W, Cin, Cout, Cm, Cmp):
    HW = H * W
    fin = fin_ref[0]      # (Cin,  HW)
    fout = fout_ref[0]    # (Cout, HW)
    masks = msk_ref[...]  # (16, HW) — rows 0..8 are the 3x3 boundary masks

    # --- static slices out of the packed parameter slabs -------------------
    W1 = w1x1_ref[:, 0:Cout]                                  # (Cin, Cout)  BN folded
    Wci = w1x1_ref[:, Cout:Cout + Cin]                        # (Cin, Cin)
    Wco = w1x1_ref[:, Cout + Cin:Cout + 2 * Cin]              # (Cin, Cin)
    W2 = w1x1_ref[0:Cmp, Cout + 2 * Cin:Cout + 3 * Cin]       # (Cmp, Cin)
    W3f = w3x3_ref[0:Cmp, :]                                  # (Cmp, 9*Cmp)
    W4f = w3x3_ref[Cmp:2 * Cmp, :]                            # (Cmp, 9*Cmp)

    b1 = vec_ref[:, 0:1]
    bc = vec_ref[:, 1:2]
    b2 = vec_ref[0:Cmp, 2:3]
    g2 = vec_ref[0:Cmp, 3:4]
    be2 = vec_ref[0:Cmp, 4:5]
    b3 = vec_ref[0:Cmp, 5:6]
    g3 = vec_ref[0:Cmp, 6:7]
    be3 = vec_ref[0:Cmp, 7:8]
    b4 = vec_ref[0:Cmp, 8:9]
    g4 = vec_ref[0:Cmp, 9:10]
    be4 = vec_ref[0:Cmp, 10:11]

    # --- conv1x1 (eval-mode BatchNorm folded) + ReLU ------------------------
    fo = jnp.maximum(
        jnp.dot(W1, fout, preferred_element_type=jnp.float32) + b1, 0.0)

    # --- channel concat + 1x1 conv  ==  split matmul ------------------------
    fc = (jnp.dot(Wci, fin, preferred_element_type=jnp.float32)
          + jnp.dot(Wco, fo, preferred_element_type=jnp.float32) + bc)

    # --- conv1x1_2 + GroupNorm(1, Cm) + ReLU  (Cmp-padded channels) ---------
    inv_n = 1.0 / float(Cm * HW)
    t = jnp.dot(W2, fc, preferred_element_type=jnp.float32) + b2
    t = _gn_relu(t, g2, be2, inv_n)

    # --- static shifts for both 3x3 convs (taps in ky-major order) ----------
    shifts = []
    for k in range(9):
        dy = k // 3 - 1
        dx = k % 3 - 1
        shifts.append((-(dy * W + dx)) % HW)

    # --- conv3x3 + GroupNorm + ReLU -----------------------------------------
    t = _gn_relu(_conv3x3_fused(t, W3f, b3, shifts, masks), g3, be3, inv_n)

    # --- conv3x3_2 (2 real out-channels) + GroupNorm + ReLU + sigmoid -------
    inv_n4 = 1.0 / float(2 * HW)
    s = _gn_relu(_conv3x3_fused(t, W4f, b4, shifts, masks), g4, be4, inv_n4)
    s = jax.nn.sigmoid(s)

    # --- F_first = F_in * w1 + F_out' * w2 ----------------------------------
    o_ref[0] = fin * s[0:1, :] + fo * s[1:2, :]


# ------------------------------ param setup -------------------------------

def make_params(key, Cin, Cout):
    """Deterministic synthetic parameters in PyTorch layouts (OIHW etc.)."""
    Cm = Cin // 8
    ks = iter(jax.random.split(key, 32))
    nrm = lambda shape, s=0.2: s * jax.random.normal(next(ks), shape, jnp.float32)
    return dict(
        w1=nrm((Cin, Cout, 1, 1)), b1=nrm((Cin,), 0.1),
        bn_g=1.0 + nrm((Cin,), 0.1), bn_b=nrm((Cin,), 0.1),
        bn_mean=nrm((Cin,), 0.1),
        bn_var=1.0 + jax.random.uniform(next(ks), (Cin,), jnp.float32, 0.0, 0.5),
        wc=nrm((Cin, 2 * Cin, 1, 1)), bc=nrm((Cin,), 0.1),
        w2=nrm((Cm, Cin, 1, 1)), b2=nrm((Cm,), 0.1),
        g2=1.0 + nrm((Cm,), 0.1), be2=nrm((Cm,), 0.1),
        w3=nrm((Cm, Cm, 3, 3)), b3=nrm((Cm,), 0.1),
        g3=1.0 + nrm((Cm,), 0.1), be3=nrm((Cm,), 0.1),
        w4=nrm((2, Cm, 3, 3)), b4=nrm((2,), 0.1),
        g4=1.0 + nrm((2,), 0.1), be4=nrm((2,), 0.1),
    )


def kernel_params(P, Cin, Cout, Cmp):
    """PyTorch-layout params -> 3 packed, channel-major, zero-padded slabs."""
    Cm = Cin // 8

    # fold eval-mode BatchNorm into the first 1x1 conv
    scale = P["bn_g"] / jnp.sqrt(P["bn_var"] + EPS)
    W1eff = P["w1"][:, :, 0, 0] * scale[:, None]                   # (Cin, Cout)
    b1eff = (P["b1"] - P["bn_mean"]) * scale + P["bn_b"]           # (Cin,)

    Wc = P["wc"][:, :, 0, 0]                                       # (Cin, 2Cin)
    Wci, Wco = Wc[:, :Cin], Wc[:, Cin:]

    W2 = P["w2"][:, :, 0, 0]                                       # (Cm, Cin)
    W2p = jnp.pad(W2, ((0, Cin - Cm), (0, 0)))                     # rows -> Cin

    # slab 1: all 1x1 weights, rows = Cin
    w1x1 = jnp.concatenate([W1eff, Wci, Wco, W2p], axis=1)         # (Cin, Cout+3Cin)

    # slab 2: both 3x3 convs, tap-major fused layout, padded to Cmp
    def fuse3x3(w):
        cout, cin = w.shape[0], w.shape[1]
        wt = jnp.transpose(w, (2, 3, 0, 1)).reshape(9, cout, cin)  # (tap,out,in)
        wt = jnp.pad(wt, ((0, 0), (0, Cmp - cout), (0, Cmp - cin)))
        return jnp.transpose(wt, (1, 0, 2)).reshape(Cmp, 9 * Cmp)  # (Cmp, 9*Cmp)

    w3x3 = jnp.concatenate([fuse3x3(P["w3"]), fuse3x3(P["w4"])], axis=0)

    # slab 3: every bias / gamma / beta as one column, zero-padded to Cin rows
    padv = lambda v: jnp.pad(v, (0, Cin - v.shape[0]))
    vecs = jnp.stack(
        [b1eff, P["bc"],
         padv(P["b2"]), padv(P["g2"]), padv(P["be2"]),
         padv(P["b3"]), padv(P["g3"]), padv(P["be3"]),
         padv(P["b4"]), padv(P["g4"]), padv(P["be4"])],
        axis=1)                                                    # (Cin, 11)
    return w1x1, w3x3, vecs


def make_masks(H, W):
    """(16, HW) f32 slab; rows 0..8 = per-tap boundary validity masks."""
    HW = H * W
    pos = np.arange(HW)
    row, col = pos // W, pos % W
    rows = []
    for k in range(9):
        dy, dx = k // 3 - 1, k % 3 - 1
        m = ((row + dy >= 0) & (row + dy < H) &
             (col + dx >= 0) & (col + dx < W))
        rows.append(m.astype(np.float32))
    masks = np.stack(rows, axis=0)                       # (9, HW)
    masks = np.pad(masks, ((0, 16 - 9), (0, 0)))         # sublane-aligned rows
    return jnp.asarray(masks)


# ------------------------------- wrapper -----------------------------------

@jax.jit
def csff_forward(F_in, F_out, P):
    B, Cin, H, W = F_in.shape
    Cout = F_out.shape[1]
    Cm = Cin // 8
    Cmp = max(8, ((Cm + 7) // 8) * 8)       # pad tiny channel dims to a sublane tile
    assert Cmp <= Cin
    HW = H * W

    fin = F_in.reshape(B, Cin, HW)
    fout = F_out.reshape(B, Cout, HW)
    w1x1, w3x3, vecs = kernel_params(P, Cin, Cout, Cmp)
    masks = make_masks(H, W)

    in_specs = [
        pl.BlockSpec((1, Cin, HW), lambda b: (b, 0, 0)),
        pl.BlockSpec((1, Cout, HW), lambda b: (b, 0, 0)),
        pl.BlockSpec(w1x1.shape, lambda b: (0, 0)),
        pl.BlockSpec(w3x3.shape, lambda b: (0, 0)),
        pl.BlockSpec(vecs.shape, lambda b: (0, 0)),
        pl.BlockSpec(masks.shape, lambda b: (0, 0)),
    ]
    out_spec = pl.BlockSpec((1, Cin, HW), lambda b: (b, 0, 0))

    out = pl.pallas_call(
        functools.partial(csff_kernel, H=H, W=W, Cin=Cin, Cout=Cout,
                          Cm=Cm, Cmp=Cmp),
        out_shape=jax.ShapeDtypeStruct((B, Cin, HW), jnp.float32),
        grid=(B,),
        in_specs=in_specs,
        out_specs=out_spec,
        compiler_params=pltpu.CompilerParams(
            dimension_semantics=("parallel",)),   # batch across TCs on v7x
    )(fin, fout, w1x1, w3x3, vecs, masks)
    return out.reshape(B, Cin, H, W)


# --------------------------- pure-JAX reference ----------------------------

def ref_forward(F_in, F_out, P):
    hp = jax.lax.Precision.HIGHEST

    def conv(x, w, b, pad):
        y = jax.lax.conv_general_dilated(
            x, w, window_strides=(1, 1), padding=[(pad, pad), (pad, pad)],
            dimension_numbers=("NCHW", "OIHW", "NCHW"), precision=hp)
        return y + b[None, :, None, None]

    def gn1(x, g, bta):
        mu = jnp.mean(x, axis=(1, 2, 3), keepdims=True)
        var = jnp.mean((x - mu) ** 2, axis=(1, 2, 3), keepdims=True)
        return (x - mu) / jnp.sqrt(var + EPS) * g[None, :, None, None] + bta[None, :, None, None]

    y = conv(F_out, P["w1"], P["b1"], 0)
    y = ((y - P["bn_mean"][None, :, None, None])
         / jnp.sqrt(P["bn_var"][None, :, None, None] + EPS)
         * P["bn_g"][None, :, None, None] + P["bn_b"][None, :, None, None])
    fo = jax.nn.relu(y)
    fc = conv(jnp.concatenate([F_in, fo], axis=1), P["wc"], P["bc"], 0)
    t = jax.nn.relu(gn1(conv(fc, P["w2"], P["b2"], 0), P["g2"], P["be2"]))
    t = jax.nn.relu(gn1(conv(t, P["w3"], P["b3"], 1), P["g3"], P["be3"]))
    s = jax.nn.sigmoid(jax.nn.relu(gn1(conv(t, P["w4"], P["b4"], 1), P["g4"], P["be4"])))
    return F_in * s[:, 0:1] + fo * s[:, 1:2]


# ---------------------------------- main -----------------------------------

if __name__ == "__main__":
    B, Cin, Cout, H, W = 2, 16, 32, 16, 16
    key = jax.random.PRNGKey(0)
    k1, k2, k3 = jax.random.split(key, 3)
    F_in = jax.random.normal(k1, (B, Cin, H, W), jnp.float32)
    F_out = jax.random.normal(k2, (B, Cout, H, W), jnp.float32)
    P = make_params(k3, Cin, Cout)

    out = jax.block_until_ready(csff_forward(F_in, F_out, P))
    ref = jax.block_until_ready(ref_forward(F_in, F_out, P))
    # default (bf16-pass) MXU precision in the kernel vs. HIGHEST-precision
    # reference -> loose tolerance; still catches any structural/indexing bug.
    np.testing.assert_allclose(np.asarray(out), np.asarray(ref), rtol=5e-2, atol=5e-2)
    print("KERNEL_OK")
</pallas_src>

<mosaic_0001>
module attributes {stable_mosaic.version = 11 : i64} {
  func.func @csff_kernel(%arg0: i32, %arg1: memref<1x16x256xf32, #tpu.memory_space<vmem>>, %arg2: memref<1x32x256xf32, #tpu.memory_space<vmem>>, %arg3: memref<16x80xf32, #tpu.memory_space<vmem>>, %arg4: memref<16x72xf32, #tpu.memory_space<vmem>>, %arg5: memref<16x11xf32, #tpu.memory_space<vmem>>, %arg6: memref<16x256xf32, #tpu.memory_space<vmem>>, %arg7: memref<1x16x256xf32, #tpu.memory_space<vmem>>) attributes {dimension_semantics = [#tpu.dimension_semantics<parallel>], iteration_bounds = array<i64: 2>, scalar_prefetch = 0 : i64, scratch_operands = 0 : i64, tpu.core_type = #tpu.core_type<tc>, window_params = [{transform_indices = @transform_0, window_bounds = array<i64: 1, 16, 256>}, {transform_indices = @transform_1, window_bounds = array<i64: 1, 32, 256>}, {pipeline_mode = #tpu.pipeline_mode<synchronous>, transform_indices = @transform_2, window_bounds = array<i64: 16, 80>}, {pipeline_mode = #tpu.pipeline_mode<synchronous>, transform_indices = @transform_3, window_bounds = array<i64: 16, 72>}, {pipeline_mode = #tpu.pipeline_mode<synchronous>, transform_indices = @transform_4, window_bounds = array<i64: 16, 11>}, {pipeline_mode = #tpu.pipeline_mode<synchronous>, transform_indices = @transform_5, window_bounds = array<i64: 16, 256>}, {transform_indices = @transform_6, window_bounds = array<i64: 1, 16, 256>}]} {
    %c0 = arith.constant 0 : index
    %c0_0 = arith.constant 0 : index
    %c0_1 = arith.constant 0 : index
    %0 = vector.load %arg1[%c0, %c0_0, %c0_1] : memref<1x16x256xf32, #tpu.memory_space<vmem>>, vector<1x16x256xf32>
    %1 = vector.shape_cast %0 : vector<1x16x256xf32> to vector<16x256xf32>
    %c0_2 = arith.constant 0 : index
    %c0_3 = arith.constant 0 : index
    %c0_4 = arith.constant 0 : index
    %2 = vector.load %arg2[%c0_2, %c0_3, %c0_4] : memref<1x32x256xf32, #tpu.memory_space<vmem>>, vector<1x32x256xf32>
    %3 = vector.shape_cast %2 : vector<1x32x256xf32> to vector<32x256xf32>
    %c0_5 = arith.constant 0 : index
    %c0_6 = arith.constant 0 : index
    %4 = vector.load %arg6[%c0_5, %c0_6] : memref<16x256xf32, #tpu.memory_space<vmem>>, vector<16x256xf32>
    %c0_7 = arith.constant 0 : index
    %c0_8 = arith.constant 0 : index
    %5 = vector.load %arg3[%c0_7, %c0_8] : memref<16x80xf32, #tpu.memory_space<vmem>>, vector<16x32xf32>
    %c0_9 = arith.constant 0 : index
    %c32 = arith.constant 32 : index
    %6 = vector.load %arg3[%c0_9, %c32] : memref<16x80xf32, #tpu.memory_space<vmem>>, vector<16x16xf32>
    %c0_10 = arith.constant 0 : index
    %c48 = arith.constant 48 : index
    %7 = vector.load %arg3[%c0_10, %c48] : memref<16x80xf32, #tpu.memory_space<vmem>>, vector<16x16xf32>
    %c0_11 = arith.constant 0 : index
    %c64 = arith.constant 64 : index
    %8 = vector.load %arg3[%c0_11, %c64] : memref<16x80xf32, #tpu.memory_space<vmem>>, vector<8x16xf32>
    %c0_12 = arith.constant 0 : index
    %c0_13 = arith.constant 0 : index
    %9 = vector.load %arg4[%c0_12, %c0_13] : memref<16x72xf32, #tpu.memory_space<vmem>>, vector<8x72xf32>
    %c8 = arith.constant 8 : index
    %c0_14 = arith.constant 0 : index
    %10 = vector.load %arg4[%c8, %c0_14] : memref<16x72xf32, #tpu.memory_space<vmem>>, vector<8x72xf32>
    %c0_15 = arith.constant 0 : index
    %c0_16 = arith.constant 0 : index
    %11 = vector.load %arg5[%c0_15, %c0_16] : memref<16x11xf32, #tpu.memory_space<vmem>>, vector<16x1xf32>
    %c0_17 = arith.constant 0 : index
    %c1 = arith.constant 1 : index
    %12 = vector.load %arg5[%c0_17, %c1] : memref<16x11xf32, #tpu.memory_space<vmem>>, vector<16x1xf32>
    %c0_18 = arith.constant 0 : index
    %c2 = arith.constant 2 : index
    %13 = vector.load %arg5[%c0_18, %c2] : memref<16x11xf32, #tpu.memory_space<vmem>>, vector<8x1xf32>
    %c0_19 = arith.constant 0 : index
    %c3 = arith.constant 3 : index
    %14 = vector.load %arg5[%c0_19, %c3] : memref<16x11xf32, #tpu.memory_space<vmem>>, vector<8x1xf32>
    %c0_20 = arith.constant 0 : index
    %c4 = arith.constant 4 : index
    %15 = vector.load %arg5[%c0_20, %c4] : memref<16x11xf32, #tpu.memory_space<vmem>>, vector<8x1xf32>
    %c0_21 = arith.constant 0 : index
    %c5 = arith.constant 5 : index
    %16 = vector.load %arg5[%c0_21, %c5] : memref<16x11xf32, #tpu.memory_space<vmem>>, vector<8x1xf32>
    %c0_22 = arith.constant 0 : index
    %c6 = arith.constant 6 : index
    %17 = vector.load %arg5[%c0_22, %c6] : memref<16x11xf32, #tpu.memory_space<vmem>>, vector<8x1xf32>
    %c0_23 = arith.constant 0 : index
    %c7 = arith.constant 7 : index
    %18 = vector.load %arg5[%c0_23, %c7] : memref<16x11xf32, #tpu.memory_space<vmem>>, vector<8x1xf32>
    %c0_24 = arith.constant 0 : index
    %c8_25 = arith.constant 8 : index
    %19 = vector.load %arg5[%c0_24, %c8_25] : memref<16x11xf32, #tpu.memory_space<vmem>>, vector<8x1xf32>
    %c0_26 = arith.constant 0 : index
    %c9 = arith.constant 9 : index
    %20 = vector.load %arg5[%c0_26, %c9] : memref<16x11xf32, #tpu.memory_space<vmem>>, vector<8x1xf32>
    %c0_27 = arith.constant 0 : index
    %c10 = arith.constant 10 : index
    %21 = vector.load %arg5[%c0_27, %c10] : memref<16x11xf32, #tpu.memory_space<vmem>>, vector<8x1xf32>
    %cst = arith.constant dense<0.000000e+00> : vector<16x256xf32>
    %22 = tpu.matmul %5, %3, %cst {dimension_numbers = #tpu.dot_dimension_numbers<[1], [0], [0], [1], [0, 0, 1, 1], [], []>} : vector<16x32xf32>, vector<32x256xf32>, vector<16x256xf32> -> vector<16x256xf32>
    %23 = vector.broadcast %11 : vector<16x1xf32> to vector<16x256xf32>
    %24 = arith.addf %22, %23 : vector<16x256xf32>
    %cst_28 = arith.constant 0.000000e+00 : f32
    %25 = vector.broadcast %cst_28 : f32 to vector<16x256xf32>
    %26 = arith.maximumf %24, %25 : vector<16x256xf32>
    %cst_29 = arith.constant dense<0.000000e+00> : vector<16x256xf32>
    %27 = tpu.matmul %6, %1, %cst_29 {dimension_numbers = #tpu.dot_dimension_numbers<[1], [0], [0], [1], [0, 0, 1, 1], [], []>} : vector<16x16xf32>, vector<16x256xf32>, vector<16x256xf32> -> vector<16x256xf32>
    %cst_30 = arith.constant dense<0.000000e+00> : vector<16x256xf32>
    %28 = tpu.matmul %7, %26, %cst_30 {dimension_numbers = #tpu.dot_dimension_numbers<[1], [0], [0], [1], [0, 0, 1, 1], [], []>} : vector<16x16xf32>, vector<16x256xf32>, vector<16x256xf32> -> vector<16x256xf32>
    %29 = arith.addf %27, %28 : vector<16x256xf32>
    %30 = vector.broadcast %12 : vector<16x1xf32> to vector<16x256xf32>
    %31 = arith.addf %29, %30 : vector<16x256xf32>
    %cst_31 = arith.constant dense<0.000000e+00> : vector<8x256xf32>
    %32 = tpu.matmul %8, %31, %cst_31 {dimension_numbers = #tpu.dot_dimension_numbers<[1], [0], [0], [1], [0, 0, 1, 1], [], []>} : vector<8x16xf32>, vector<16x256xf32>, vector<8x256xf32> -> vector<8x256xf32>
    %33 = vector.broadcast %13 : vector<8x1xf32> to vector<8x256xf32>
    %34 = arith.addf %32, %33 : vector<8x256xf32>
    %35 = vector.shape_cast %34 : vector<8x256xf32> to vector<1x8x256xf32>
    %cst_32 = arith.constant dense<0.000000e+00> : vector<1xf32>
    %36 = vector.multi_reduction <add>, %35, %cst_32 [1, 2] : vector<1x8x256xf32> to vector<1xf32>
    %37 = vector.shape_cast %36 : vector<1xf32> to vector<1x1x1xf32>
    %38 = vector.extract %37[0, 0, 0] : f32 from vector<1x1x1xf32>
    %39 = arith.mulf %34, %34 : vector<8x256xf32>
    %40 = vector.shape_cast %39 : vector<8x256xf32> to vector<1x8x256xf32>
    %cst_33 = arith.constant dense<0.000000e+00> : vector<1xf32>
    %41 = vector.multi_reduction <add>, %40, %cst_33 [1, 2] : vector<1x8x256xf32> to vector<1xf32>
    %42 = vector.shape_cast %41 : vector<1xf32> to vector<1x1x1xf32>
    %43 = vector.extract %42[0, 0, 0] : f32 from vector<1x1x1xf32>
    %cst_34 = arith.constant 0.001953125 : f32
    %44 = arith.mulf %38, %cst_34 : f32
    %cst_35 = arith.constant 0.001953125 : f32
    %45 = arith.mulf %43, %cst_35 : f32
    %46 = arith.mulf %44, %44 : f32
    %47 = arith.subf %45, %46 : f32
    %cst_36 = arith.constant 0.000000e+00 : f32
    %48 = arith.maximumf %47, %cst_36 : f32
    %49 = vector.broadcast %44 : f32 to vector<8x256xf32>
    %50 = arith.subf %34, %49 : vector<8x256xf32>
    %cst_37 = arith.constant 9.99999974E-6 : f32
    %51 = arith.addf %48, %cst_37 : f32
    %52 = math.rsqrt %51 : f32
    %53 = vector.broadcast %52 : f32 to vector<8x256xf32>
    %54 = arith.mulf %50, %53 : vector<8x256xf32>
    %55 = vector.broadcast %14 : vector<8x1xf32> to vector<8x256xf32>
    %56 = arith.mulf %54, %55 : vector<8x256xf32>
    %57 = vector.broadcast %15 : vector<8x1xf32> to vector<8x256xf32>
    %58 = arith.addf %56, %57 : vector<8x256xf32>
    %cst_38 = arith.constant 0.000000e+00 : f32
    %59 = vector.broadcast %cst_38 : f32 to vector<8x256xf32>
    %60 = arith.maximumf %58, %59 : vector<8x256xf32>
    %c17_i32 = arith.constant 17 : i32
    %61 = tpu.dynamic_rotate %60 by %c17_i32 dim 1 : vector<8x256xf32>, i32 -> vector<8x256xf32>
    %62 = vector.extract_strided_slice %4 {offsets = [0, 0], sizes = [1, 256], strides = [1, 1]} : vector<16x256xf32> to vector<1x256xf32>
    %63 = vector.broadcast %62 : vector<1x256xf32> to vector<8x256xf32>
    %64 = arith.mulf %61, %63 : vector<8x256xf32>
    %c16_i32 = arith.constant 16 : i32
    %65 = tpu.dynamic_rotate %60 by %c16_i32 dim 1 : vector<8x256xf32>, i32 -> vector<8x256xf32>
    %66 = vector.extract_strided_slice %4 {offsets = [1, 0], sizes = [1, 256], strides = [1, 1]} : vector<16x256xf32> to vector<1x256xf32>
    %67 = vector.broadcast %66 : vector<1x256xf32> to vector<8x256xf32>
    %68 = arith.mulf %65, %67 : vector<8x256xf32>
    %c15_i32 = arith.constant 15 : i32
    %69 = tpu.dynamic_rotate %60 by %c15_i32 dim 1 : vector<8x256xf32>, i32 -> vector<8x256xf32>
    %70 = vector.extract_strided_slice %4 {offsets = [2, 0], sizes = [1, 256], strides = [1, 1]} : vector<16x256xf32> to vector<1x256xf32>
    %71 = vector.broadcast %70 : vector<1x256xf32> to vector<8x256xf32>
    %72 = arith.mulf %69, %71 : vector<8x256xf32>
    %c1_i32 = arith.constant 1 : i32
    %73 = tpu.dynamic_rotate %60 by %c1_i32 dim 1 : vector<8x256xf32>, i32 -> vector<8x256xf32>
    %74 = vector.extract_strided_slice %4 {offsets = [3, 0], sizes = [1, 256], strides = [1, 1]} : vector<16x256xf32> to vector<1x256xf32>
    %75 = vector.broadcast %74 : vector<1x256xf32> to vector<8x256xf32>
    %76 = arith.mulf %73, %75 : vector<8x256xf32>
    %c255_i32 = arith.constant 255 : i32
    %77 = tpu.dynamic_rotate %60 by %c255_i32 dim 1 : vector<8x256xf32>, i32 -> vector<8x256xf32>
    %78 = vector.extract_strided_slice %4 {offsets = [5, 0], sizes = [1, 256], strides = [1, 1]} : vector<16x256xf32> to vector<1x256xf32>
    %79 = vector.broadcast %78 : vector<1x256xf32> to vector<8x256xf32>
    %80 = arith.mulf %77, %79 : vector<8x256xf32>
    %c241_i32 = arith.constant 241 : i32
    %81 = tpu.dynamic_rotate %60 by %c241_i32 dim 1 : vector<8x256xf32>, i32 -> vector<8x256xf32>
    %82 = vector.extract_strided_slice %4 {offsets = [6, 0], sizes = [1, 256], strides = [1, 1]} : vector<16x256xf32> to vector<1x256xf32>
    %83 = vector.broadcast %82 : vector<1x256xf32> to vector<8x256xf32>
    %84 = arith.mulf %81, %83 : vector<8x256xf32>
    %c240_i32 = arith.constant 240 : i32
    %85 = tpu.dynamic_rotate %60 by %c240_i32 dim 1 : vector<8x256xf32>, i32 -> vector<8x256xf32>
    %86 = vector.extract_strided_slice %4 {offsets = [7, 0], sizes = [1, 256], strides = [1, 1]} : vector<16x256xf32> to vector<1x256xf32>
    %87 = vector.broadcast %86 : vector<1x256xf32> to vector<8x256xf32>
    %88 = arith.mulf %85, %87 : vector<8x256xf32>
    %c239_i32 = arith.constant 239 : i32
    %89 = tpu.dynamic_rotate %60 by %c239_i32 dim 1 : vector<8x256xf32>, i32 -> vector<8x256xf32>
    %90 = vector.extract_strided_slice %4 {offsets = [8, 0], sizes = [1, 256], strides = [1, 1]} : vector<16x256xf32> to vector<1x256xf32>
    %91 = vector.broadcast %90 : vector<1x256xf32> to vector<8x256xf32>
    %92 = arith.mulf %89, %91 : vector<8x256xf32>
    %93 = tpu.concatenate %64, %68, %72, %76, %60, %80, %84, %88, %92 in 0 : vector<8x256xf32>, vector<8x256xf32>, vector<8x256xf32>, vector<8x256xf32>, vector<8x256xf32>, vector<8x256xf32>, vector<8x256xf32>, vector<8x256xf32>, vector<8x256xf32> -> vector<72x256xf32>
    %cst_39 = arith.constant dense<0.000000e+00> : vector<8x256xf32>
    %94 = tpu.matmul %9, %93, %cst_39 {dimension_numbers = #tpu.dot_dimension_numbers<[1], [0], [0], [1], [0, 0, 1, 1], [], []>} : vector<8x72xf32>, vector<72x256xf32>, vector<8x256xf32> -> vector<8x256xf32>
    %95 = vector.broadcast %16 : vector<8x1xf32> to vector<8x256xf32>
    %96 = arith.addf %94, %95 : vector<8x256xf32>
    %97 = vector.shape_cast %96 : vector<8x256xf32> to vector<1x8x256xf32>
    %cst_40 = arith.constant dense<0.000000e+00> : vector<1xf32>
    %98 = vector.multi_reduction <add>, %97, %cst_40 [1, 2] : vector<1x8x256xf32> to vector<1xf32>
    %99 = vector.shape_cast %98 : vector<1xf32> to vector<1x1x1xf32>
    %100 = vector.extract %99[0, 0, 0] : f32 from vector<1x1x1xf32>
    %101 = arith.mulf %96, %96 : vector<8x256xf32>
    %102 = vector.shape_cast %101 : vector<8x256xf32> to vector<1x8x256xf32>
    %cst_41 = arith.constant dense<0.000000e+00> : vector<1xf32>
    %103 = vector.multi_reduction <add>, %102, %cst_41 [1, 2] : vector<1x8x256xf32> to vector<1xf32>
    %104 = vector.shape_cast %103 : vector<1xf32> to vector<1x1x1xf32>
    %105 = vector.extract %104[0, 0, 0] : f32 from vector<1x1x1xf32>
    %cst_42 = arith.constant 0.001953125 : f32
    %106 = arith.mulf %100, %cst_42 : f32
    %cst_43 = arith.constant 0.001953125 : f32
    %107 = arith.mulf %105, %cst_43 : f32
    %108 = arith.mulf %106, %106 : f32
    %109 = arith.subf %107, %108 : f32
    %cst_44 = arith.constant 0.000000e+00 : f32
    %110 = arith.maximumf %109, %cst_44 : f32
    %111 = vector.broadcast %106 : f32 to vector<8x256xf32>
    %112 = arith.subf %96, %111 : vector<8x256xf32>
    %cst_45 = arith.constant 9.99999974E-6 : f32
    %113 = arith.addf %110, %cst_45 : f32
    %114 = math.rsqrt %113 : f32
    %115 = vector.broadcast %114 : f32 to vector<8x256xf32>
    %116 = arith.mulf %112, %115 : vector<8x256xf32>
    %117 = vector.broadcast %17 : vector<8x1xf32> to vector<8x256xf32>
    %118 = arith.mulf %116, %117 : vector<8x256xf32>
    %119 = vector.broadcast %18 : vector<8x1xf32> to vector<8x256xf32>
    %120 = arith.addf %118, %119 : vector<8x256xf32>
    %cst_46 = arith.constant 0.000000e+00 : f32
    %121 = vector.broadcast %cst_46 : f32 to vector<8x256xf32>
    %122 = arith.maximumf %120, %121 : vector<8x256xf32>
    %c17_i32_47 = arith.constant 17 : i32
    %123 = tpu.dynamic_rotate %122 by %c17_i32_47 dim 1 : vector<8x256xf32>, i32 -> vector<8x256xf32>
    %124 = vector.extract_strided_slice %4 {offsets = [0, 0], sizes = [1, 256], strides = [1, 1]} : vector<16x256xf32> to vector<1x256xf32>
    %125 = vector.broadcast %124 : vector<1x256xf32> to vector<8x256xf32>
    %126 = arith.mulf %123, %125 : vector<8x256xf32>
    %c16_i32_48 = arith.constant 16 : i32
    %127 = tpu.dynamic_rotate %122 by %c16_i32_48 dim 1 : vector<8x256xf32>, i32 -> vector<8x256xf32>
    %128 = vector.extract_strided_slice %4 {offsets = [1, 0], sizes = [1, 256], strides = [1, 1]} : vector<16x256xf32> to vector<1x256xf32>
    %129 = vector.broadcast %128 : vector<1x256xf32> to vector<8x256xf32>
    %130 = arith.mulf %127, %129 : vector<8x256xf32>
    %c15_i32_49 = arith.constant 15 : i32
    %131 = tpu.dynamic_rotate %122 by %c15_i32_49 dim 1 : vector<8x256xf32>, i32 -> vector<8x256xf32>
    %132 = vector.extract_strided_slice %4 {offsets = [2, 0], sizes = [1, 256], strides = [1, 1]} : vector<16x256xf32> to vector<1x256xf32>
    %133 = vector.broadcast %132 : vector<1x256xf32> to vector<8x256xf32>
    %134 = arith.mulf %131, %133 : vector<8x256xf32>
    %c1_i32_50 = arith.constant 1 : i32
    %135 = tpu.dynamic_rotate %122 by %c1_i32_50 dim 1 : vector<8x256xf32>, i32 -> vector<8x256xf32>
    %136 = vector.extract_strided_slice %4 {offsets = [3, 0], sizes = [1, 256], strides = [1, 1]} : vector<16x256xf32> to vector<1x256xf32>
    %137 = vector.broadcast %136 : vector<1x256xf32> to vector<8x256xf32>
    %138 = arith.mulf %135, %137 : vector<8x256xf32>
    %c255_i32_51 = arith.constant 255 : i32
    %139 = tpu.dynamic_rotate %122 by %c255_i32_51 dim 1 : vector<8x256xf32>, i32 -> vector<8x256xf32>
    %140 = vector.extract_strided_slice %4 {offsets = [5, 0], sizes = [1, 256], strides = [1, 1]} : vector<16x256xf32> to vector<1x256xf32>
    %141 = vector.broadcast %140 : vector<1x256xf32> to vector<8x256xf32>
    %142 = arith.mulf %139, %141 : vector<8x256xf32>
    %c241_i32_52 = arith.constant 241 : i32
    %143 = tpu.dynamic_rotate %122 by %c241_i32_52 dim 1 : vector<8x256xf32>, i32 -> vector<8x256xf32>
    %144 = vector.extract_strided_slice %4 {offsets = [6, 0], sizes = [1, 256], strides = [1, 1]} : vector<16x256xf32> to vector<1x256xf32>
    %145 = vector.broadcast %144 : vector<1x256xf32> to vector<8x256xf32>
    %146 = arith.mulf %143, %145 : vector<8x256xf32>
    %c240_i32_53 = arith.constant 240 : i32
    %147 = tpu.dynamic_rotate %122 by %c240_i32_53 dim 1 : vector<8x256xf32>, i32 -> vector<8x256xf32>
    %148 = vector.extract_strided_slice %4 {offsets = [7, 0], sizes = [1, 256], strides = [1, 1]} : vector<16x256xf32> to vector<1x256xf32>
    %149 = vector.broadcast %148 : vector<1x256xf32> to vector<8x256xf32>
    %150 = arith.mulf %147, %149 : vector<8x256xf32>
    %c239_i32_54 = arith.constant 239 : i32
    %151 = tpu.dynamic_rotate %122 by %c239_i32_54 dim 1 : vector<8x256xf32>, i32 -> vector<8x256xf32>
    %152 = vector.extract_strided_slice %4 {offsets = [8, 0], sizes = [1, 256], strides = [1, 1]} : vector<16x256xf32> to vector<1x256xf32>
    %153 = vector.broadcast %152 : vector<1x256xf32> to vector<8x256xf32>
    %154 = arith.mulf %151, %153 : vector<8x256xf32>
    %155 = tpu.concatenate %126, %130, %134, %138, %122, %142, %146, %150, %154 in 0 : vector<8x256xf32>, vector<8x256xf32>, vector<8x256xf32>, vector<8x256xf32>, vector<8x256xf32>, vector<8x256xf32>, vector<8x256xf32>, vector<8x256xf32>, vector<8x256xf32> -> vector<72x256xf32>
    %cst_55 = arith.constant dense<0.000000e+00> : vector<8x256xf32>
    %156 = tpu.matmul %10, %155, %cst_55 {dimension_numbers = #tpu.dot_dimension_numbers<[1], [0], [0], [1], [0, 0, 1, 1], [], []>} : vector<8x72xf32>, vector<72x256xf32>, vector<8x256xf32> -> vector<8x256xf32>
    %157 = vector.broadcast %19 : vector<8x1xf32> to vector<8x256xf32>
    %158 = arith.addf %156, %157 : vector<8x256xf32>
    %159 = vector.shape_cast %158 : vector<8x256xf32> to vector<1x8x256xf32>
    %cst_56 = arith.constant dense<0.000000e+00> : vector<1xf32>
    %160 = vector.multi_reduction <add>, %159, %cst_56 [1, 2] : vector<1x8x256xf32> to vector<1xf32>
    %161 = vector.shape_cast %160 : vector<1xf32> to vector<1x1x1xf32>
    %162 = vector.extract %161[0, 0, 0] : f32 from vector<1x1x1xf32>
    %163 = arith.mulf %158, %158 : vector<8x256xf32>
    %164 = vector.shape_cast %163 : vector<8x256xf32> to vector<1x8x256xf32>
    %cst_57 = arith.constant dense<0.000000e+00> : vector<1xf32>
    %165 = vector.multi_reduction <add>, %164, %cst_57 [1, 2] : vector<1x8x256xf32> to vector<1xf32>
    %166 = vector.shape_cast %165 : vector<1xf32> to vector<1x1x1xf32>
    %167 = vector.extract %166[0, 0, 0] : f32 from vector<1x1x1xf32>
    %cst_58 = arith.constant 0.001953125 : f32
    %168 = arith.mulf %162, %cst_58 : f32
    %cst_59 = arith.constant 0.001953125 : f32
    %169 = arith.mulf %167, %cst_59 : f32
    %170 = arith.mulf %168, %168 : f32
    %171 = arith.subf %169, %170 : f32
    %cst_60 = arith.constant 0.000000e+00 : f32
    %172 = arith.maximumf %171, %cst_60 : f32
    %173 = vector.broadcast %168 : f32 to vector<8x256xf32>
    %174 = arith.subf %158, %173 : vector<8x256xf32>
    %cst_61 = arith.constant 9.99999974E-6 : f32
    %175 = arith.addf %172, %cst_61 : f32
    %176 = math.rsqrt %175 : f32
    %177 = vector.broadcast %176 : f32 to vector<8x256xf32>
    %178 = arith.mulf %174, %177 : vector<8x256xf32>
    %179 = vector.broadcast %20 : vector<8x1xf32> to vector<8x256xf32>
    %180 = arith.mulf %178, %179 : vector<8x256xf32>
    %181 = vector.broadcast %21 : vector<8x1xf32> to vector<8x256xf32>
    %182 = arith.addf %180, %181 : vector<8x256xf32>
    %cst_62 = arith.constant 0.000000e+00 : f32
    %183 = vector.broadcast %cst_62 : f32 to vector<8x256xf32>
    %184 = arith.maximumf %182, %183 : vector<8x256xf32>
    %185 = arith.negf %184 : vector<8x256xf32>
    %186 = math.exp %185 : vector<8x256xf32>
    %cst_63 = arith.constant 1.000000e+00 : f32
    %187 = vector.broadcast %cst_63 : f32 to vector<8x256xf32>
    %188 = arith.addf %187, %186 : vector<8x256xf32>
    %189 = arith.divf %187, %188 : vector<8x256xf32>
    %190 = vector.extract_strided_slice %189 {offsets = [0, 0], sizes = [1, 256], strides = [1, 1]} : vector<8x256xf32> to vector<1x256xf32>
    %191 = vector.broadcast %190 : vector<1x256xf32> to vector<16x256xf32>
    %192 = arith.mulf %1, %191 : vector<16x256xf32>
    %193 = vector.extract_strided_slice %189 {offsets = [1, 0], sizes = [1, 256], strides = [1, 1]} : vector<8x256xf32> to vector<1x256xf32>
    %194 = vector.broadcast %193 : vector<1x256xf32> to vector<16x256xf32>
    %195 = arith.mulf %26, %194 : vector<16x256xf32>
    %196 = arith.addf %192, %195 : vector<16x256xf32>
    %c0_64 = arith.constant 0 : index
    %c0_65 = arith.constant 0 : index
    %c0_66 = arith.constant 0 : index
    %197 = vector.load %arg7[%c0_64, %c0_65, %c0_66] : memref<1x16x256xf32, #tpu.memory_space<vmem>>, vector<1x16x256xf32>
    %198 = vector.shape_cast %197 : vector<1x16x256xf32> to vector<16x256xf32>
    %199 = vector.shape_cast %196 : vector<16x256xf32> to vector<1x16x256xf32>
    tpu.vector_store %arg7[%c0_64, %c0_65, %c0_66], %199 {strides = array<i32>} : memref<1x16x256xf32, #tpu.memory_space<vmem>>, vector<1x16x256xf32>,
    return
  }
  func.func @transform_0(%arg0: i32) -> (i32, i32, i32) {
    %c0_i32 = arith.constant 0 : i32
    %c0_i32_0 = arith.constant 0 : i32
    %c0_i32_1 = arith.constant 0 : i32
    return %arg0, %c0_i32, %c0_i32_0 : i32, i32, i32
  }
  func.func @transform_1(%arg0: i32) -> (i32, i32, i32) {
    %c0_i32 = arith.constant 0 : i32
    %c0_i32_0 = arith.constant 0 : i32
    %c0_i32_1 = arith.constant 0 : i32
    return %arg0, %c0_i32, %c0_i32_0 : i32, i32, i32
  }
  func.func @transform_2(%arg0: i32) -> (i32, i32) {
    %c0_i32 = arith.constant 0 : i32
    %c0_i32_0 = arith.constant 0 : i32
    %c0_i32_1 = arith.constant 0 : i32
    return %c0_i32, %c0_i32_0 : i32, i32
  }
  func.func @transform_3(%arg0: i32) -> (i32, i32) {
    %c0_i32 = arith.constant 0 : i32
    %c0_i32_0 = arith.constant 0 : i32
    %c0_i32_1 = arith.constant 0 : i32
    return %c0_i32, %c0_i32_0 : i32, i32
  }
  func.func @transform_4(%arg0: i32) -> (i32, i32) {
    %c0_i32 = arith.constant 0 : i32
    %c0_i32_0 = arith.constant 0 : i32
    %c0_i32_1 = arith.constant 0 : i32
    return %c0_i32, %c0_i32_0 : i32, i32
  }
  func.func @transform_5(%arg0: i32) -> (i32, i32) {
    %c0_i32 = arith.constant 0 : i32
    %c0_i32_0 = arith.constant 0 : i32
    %c0_i32_1 = arith.constant 0 : i32
    return %c0_i32, %c0_i32_0 : i32, i32
  }
  func.func @transform_6(%arg0: i32) -> (i32, i32, i32) {
    %c0_i32 = arith.constant 0 : i32
    %c0_i32_0 = arith.constant 0 : i32
    %c0_i32_1 = arith.constant 0 : i32
    return %arg0, %c0_i32, %c0_i32_0 : i32, i32, i32
  }
}

</mosaic_0001>

<bundles_post_ra>
// kernel: csff_forward.1
= control target key start
LH: loop header
LB: loop body
LE: loop exit
PB: predicated region body
PF: predicated region fallthrough
CT: control target
= control target key end

     0   :  { %s1504_s21 = smov 0   ;;  %s1893_s0 = inlined_call_operand.vmem [shape: f32[2,16,256], index: 0, kind: input, shape index: {}]   ;;  %s1894_s1 = inlined_call_operand.vmem [shape: f32[2,32,256], index: 1, kind: input, shape index: {}]   ;;  %s1895_s2 = inlined_call_operand.vmem [shape: f32[16,80], index: 2, kind: input, shape index: {}]   ;;  %s1896_s3 = inlined_call_operand.vmem [shape: f32[16,72], index: 3, kind: input, shape index: {}]   ;;  %s1897_s4 = inlined_call_operand.vmem [shape: f32[16,11], index: 4, kind: input, shape index: {}]   ;;  %s1898_s5 = inlined_call_operand.vmem [shape: f32[16,256], index: 5, kind: input, shape index: {}]   ;;  %s1899_s6 = inlined_call_operand.vmem [shape: f32[2,16,256], index: 6, kind: output, shape index: {}]  }
   0x1 LB: > { %s1277_s22 = sadd.s32 4294967295, %s1443_s21   ;;  %p1281_p0 = scmp.ge.s32.totalorder %s1443_s21, 1  ;;  %s1443_s21 = sphi %s1504_s21, %s16_s21  }
   0x2   : > { %p222_p1 = scmp.lt.s32.totalorder %s1443_s21, 3 }
   0x4   : > { %p223_p2 = pnand %p1281_p0, %p222_p1 }
   0x5   : > { %p257_p3 = scmp.lt.s32.totalorder (!%p223_p2), %s1277_s22, 1  ;;  %v1445_v0 = vmov (!%p223_p2), 0.0   ;;  %v288_v1 = vld [vmem:[%s1895_s2] sm:$0xff] (!%p223_p2)  ;;  %v1446_v2 = vmov (!%p223_p2), 0   ;;  %s1447_s27 = smov (!%p223_p2), 80   ;;  %v293_v4 = vld [vmem:[%s1897_s4 + $0x8] sm:$0xff] (!%p223_p2) }
   0x6   : > { %226 = sbr.rel (%p223_p2) target bundleno = 2355 (0x933), region = 44  ;;  %375 = vmatprep.mubr.f32.mxu0 (!%p223_p2), %v1445_v0  ;;  %1410 = vset.pattern.permute.xlu0 (!%p223_p2), %v1446_v2  ;;  %v1519_v3 = vld [vmem:[%s1897_s4] sm:$0xff] (!%p223_p2)  ;;  %v289_v5 = vld [vmem:[%s1895_s2 + $0x8] sm:$0xff] (!%p223_p2)  ;;  %s1448_s12 = smov (!%p223_p2), 96   ;;  %vm304_vm0 = vcmask (!%p223_p2), 261120   ;;  %v1449_v18 = vmov (!%p223_p2), 1  }
   0x7   : > { %296 = vperm.xlu0 (!%p223_p2), %1410, %v1519_v3   ;;  %392 = vrot.lane.b32.xlu1 (!%p223_p2), %v288_v1, %s1447_s27  ;;  %s1450_s13 = smov (!%p223_p2), 64   ;;  %vm396_vm1 = vcmask (!%p223_p2), 130048   ;;  %v1451_v45 = vmov (!%p223_p2), 2   ;;  %s1454_s26 = smov (!%p223_p2), 0.0   ;;  %vm847_vm10 = vcmask (!%p223_p2), 588800  }
   0x8   : > { %465 = vmatprep.mubr.f32.mxu1 (!%p223_p2), %v1445_v0  ;;  %1412 = vset.pattern.permute.xlu1 (!%p223_p2), %v1449_v18  ;;  %s1456_s7 = smov (!%p223_p2), 17   ;;  %s1457_s8 = smov (!%p223_p2), 113  }
   0x9   : > { %s1459_s10 = smov (!%p223_p2), 16   ;;  %s1460_s11 = smov (!%p223_p2), 111  }
   0xb   : > { %301 = vperm.xlu0 (!%p223_p2), %1410, %v293_v4   ;;  %394 = vrot.lane.b32.xlu1 (!%p223_p2), %v289_v5, %s1447_s27 }
   0xd   : > { %s1901_s22 = smov (!%p257_p3, %s1277_s22), 1 }
   0xe   : > { %s1302_s30 = sshll.u32 %s1901_s22, 6  ;;  %s1301_s14 = sshll.u32 %s1901_s22, 5 }
   0xf   : > { %s266_s9 = scalar_lea.vmem %s1894_s1, %s1302_s30  ;;  %478 = vrot.lane.b32.xlu0 %v288_v1, %s1448_s12  ;;  %480 = vrot.lane.b32.xlu1 %v289_v5, %s1448_s12  ;;  %s261_s17 = scalar_lea.vmem %s1893_s0, %s1301_s14 }
  0x10   : > { %v277_v6 = vld [vmem:[%s266_s9 + $0x8] sm:$0xff]  ;;  %v279_v7 = vld [vmem:[%s266_s9 + $0x18] sm:$0xff]  ;;  %v276_v8 = vld [vmem:[%s266_s9] sm:$0xff]  ;;  %1411 = vset.pattern.permute.xlu0 %v1449_v18  ;;  %s1455_s30 = smov 127   ;;  %s1461_s12 = smov 15  }
  0x11   : > { %v1304_v9 = vpack.c.bf16 %v279_v7, %v277_v6  ;;  %v278_v10 = vld [vmem:[%s266_s9 + $0x10] sm:$0xff]  ;;  %v281_v11 = vld [vmem:[%s266_s9 + $0x28] sm:$0xff]  ;;  %v283_v12 = vld [vmem:[%s266_s9 + $0x38] sm:$0xff]  ;;  %v1452_v6 = vmov 3   ;;  %v1453_v7 = vmov 4  }
  0x12   : > { %v1306_v13 = vpack.c.bf16 %v278_v10, %v276_v8  ;;  %v1308_v14 = vpack.c.bf16 %v283_v12, %v281_v11  ;;  %v280_v15 = vld [vmem:[%s266_s9 + $0x20] sm:$0xff]  ;;  %v282_v16 = vld [vmem:[%s266_s9 + $0x30] sm:$0xff]  ;;  %v1553_v30 = vld [vmem:[%s261_s17 + $0x8] sm:$0xff]  ;;  %s1458_s9 = smov 112  }
  0x13   : > { %1305 = vmatprep.subr.bf16.mxu0 %v1304_v9  ;;  %v1310_v17 = vpack.c.bf16 %v282_v16, %v280_v15  ;;  %564 = vperm.xlu0 %1411, %v1519_v3   ;;  %v1555_v31 = vld [vmem:[%s261_s17 + $0x18] sm:$0xff]  ;;  %v1566_v37 = vld [vmem:[%s261_s17] sm:$0xff]  ;;  %v1568_v38 = vld [vmem:[%s261_s17 + $0x10] sm:$0xff] }
  0x14   : > { %1307 = vmatpush1.bf16.msra.mxu0 %v1306_v13  ;;  %568 = vperm.xlu1 %1412, %v293_v4   ;;  %v1316_v36 = vpack.c.bf16 %v1555_v31, %v1553_v30  ;;  %v1318_v41 = vpack.c.bf16 %v1568_v38, %v1566_v37 }
  0x15   : > { %1309 = vmatprep.subr.bf16.mxu0 %v1308_v14 }
  0x17   : > { %1413 = vset.pattern.permute.xlu0 %v1451_v45 }
  0x18   : > { %1311 = vmatpush1.bf16.msra.mxu0 %v1310_v17  ;;  %579 = vrot.lane.b32.xlu1 %v288_v1, %s1450_s13  ;;  %s1462_s13 = smov 1  }
  0x19   : > { %576 = vperm.xlu0 %1413, %v1519_v3   ;;  %1414 = vset.pattern.permute.xlu1 %v1452_v6 }
  0x1b   : > { %1288 = vmatmul.mubr.msk.f32.vlgmr.msra.gmra.mrb[0].mxu0 %vm304_vm0, %v288_v1 }
  0x1c   : > { %381 = vmatprep.mubr.f32.mxu0 %v1445_v0 }
  0x1d   : > { %1415 = vset.pattern.permute.xlu0 %v1453_v7 }
  0x1f   : > { %1289 = vmatmul.mubr.msk.f32.gmra.mrb[2].mxu0 %vm304_vm0, %v289_v5 }
  0x20   : > { %647 = vmatprep.mubr.f32.mxu0 %v1445_v0 }
  0x79   : > { %v393_v40 = vpop.permute.xlu1 %392 }
  0x7d   : > { %v395_v42 = vpop.permute.xlu1 %394 }
  0x81   : > { %v481_v44 = vpop.permute.xlu1 %480 }
  0x86   : > { %v297_v19 = vpop.permute.xlu0 %296 }
  0x8a   : > { %v302_v22 = vpop.permute.xlu0 %301 }
  0x8e   : > { %v479_v43 = vpop.permute.xlu0 %478 }
  0x92   : > { %v565_v48 = vpop.permute.xlu0 %564 }
  0x93   : > { %v569_v49 = vpop.permute.xlu1 %568 }
  0x97   : > { %v580_v58 = vpop.permute.xlu1 %579 }
  0x98   : > { %v577_v59 = vpop.permute.xlu0 %576 }
  0xee   : > { %v377_v20 = vpop.f32.mrb[0].mxu0 }
  0xef   : > { %v379_v21 = vpop.f32.mrb[1].mxu0  ;;  %v1546_v25 = vadd.f32 %v377_v20, %v297_v19 }
  0xf0   : > { %v1539_v23 = vadd.f32 %v379_v21, %v297_v19 }
  0xf1   : > { %v388_v34 = vmax.f32 %v1546_v25, 0.0 }
  0xf2   : > { %v383_v24 = vpop.f32.mrb[2].mxu0  ;;  %v389_v32 = vmax.f32 %v1539_v23, 0.0 }
  0xf3   : > { %v1548_v26 = vadd.f32 %v383_v24, %v302_v22  ;;  %v385_v27 = vpop.f32.mrb[3].mxu0 }
  0xf4   : > { %v1550_v28 = vadd.f32 %v385_v27, %v302_v22 }
  0xf5   : > { %v390_v29 = vmax.f32 %v1548_v26, 0.0 }
  0xf6   : > { %v391_v33 = vmax.f32 %v1550_v28, 0.0 }
  0xf7   : > { %v1314_v39 = vpack.c.bf16 %v390_v29, %v388_v34 }
  0xf8   : > { %v1312_v35 = vpack.c.bf16 %v391_v33, %v389_v32 }
  0xfa   : > { %1313 = vmatprep.subr.bf16.mxu1 %v1312_v35 }
  0xfb   : > { %1315 = vmatpush1.bf16.msra.mxu1 %v1314_v39 }
  0xfc   : > { %1317 = vmatprep.subr.bf16.mxu1 %v1316_v36 }
  0xfe   : > { %1290 = vmatmul.mubr.msk.f32.vlgmr.msra.gmra.mrb[0].mxu1 %vm396_vm1, %v393_v40 }
  0xff   : > { %471 = vmatprep.mubr.f32.mxu1 %v1445_v0  ;;  %1319 = vmatpush1.bf16.msra.mxu1 %v1318_v41 }
 0x102   : > { %1291 = vmatmul.mubr.msk.f32.gmra.mrb[2].mxu1 %vm396_vm1, %v395_v42 }
 0x103   : > { %550 = vmatprep.mubr.f32.mxu1 %v1445_v0 }
 0x106   : > { %1292 = vmatmul.mubr.msk.f32.vlgmr.msra.gmra.mrb[0].mxu1 %vm396_vm1, %v479_v43 }
 0x107   : > { %556 = vmatprep.mubr.f32.mxu1 %v1445_v0 }
 0x10a   : > { %1293 = vmatmul.mubr.msk.f32.gmra.mrb[2].mxu1 %vm396_vm1, %v481_v44 }
 0x10b   : > { %915 = vmatprep.mubr.f32.mxu1 %v1445_v0 }
 0x1d9   : > { %v552_v46 = vpop.f32.mrb[0].mxu1 }
 0x1da   : > { %v554_v47 = vpop.f32.mrb[1].mxu1  ;;  %v571_v51 = vadd.f32 %v565_v48, %v552_v46 }
 0x1db   : > { %v572_v54 = vadd.f32 %v565_v48, %v554_v47 }
 0x1dd   : > { %v558_v50 = vpop.f32.mrb[2].mxu1 }
 0x1de   : > { %v573_v52 = vadd.f32 %v569_v49, %v558_v50  ;;  %v560_v53 = vpop.f32.mrb[3].mxu1  ;;  %v709_v50 = vlaneseq }
 0x1df   : > { %v574_v55 = vadd.f32 %v569_v49, %v560_v53  ;;  %v1463_v49 = vmov 5  }
 0x1e0   : > { %v1322_v56 = vpack.c.bf16 %v573_v52, %v571_v51  ;;  %v1627_v52 = vshrl.u32 %v709_v50, 7  ;;  %v1629_v53 = vand.u32 127, %v709_v50 }
 0x1e1   : > { %v1320_v57 = vpack.c.bf16 %v574_v55, %v572_v54 }
 0x1e2   : > { %v1632_v55 = vsub.s32 0, %v1627_v52  ;;  %vm711_vm2 = vcmp.lt.s32.totalorder %v1629_v53, 17  ;;  %vm728_vm3 = vcmp.lt.s32.totalorder %v1629_v53, 16  ;;  %vm745_vm4 = vcmp.lt.s32.totalorder %v1629_v53, 15 }
 0x1e3   : > { %1321 = vmatprep.subr.bf16.mxu0 %v1320_v57  ;;  %v1640_v57 = vsub.s32 1, %v1627_v52  ;;  %vm762_vm5 = vcmp.lt.s32.totalorder %v1629_v53, 1  ;;  %vm779_vm6 = vcmp.lt.s32.totalorder %v1629_v53, 127  ;;  %vm796_vm7 = vcmp.lt.s32.totalorder %v1629_v53, 113 }
 0x1e4   : > { %1323 = vmatpush1.bf16.msra.mxu0 %v1322_v56  ;;  %v1637_v56 = vld [vmem:[%s1898_s5] sm:$0xff]  ;;  %vm813_vm8 = vcmp.lt.s32.totalorder %v1629_v53, 112  ;;  %vm830_vm9 = vcmp.lt.s32.totalorder %v1629_v53, 111 }
 0x1e7   : > { %1294 = vmatmul.mubr.msk.f32.vlgmr.msra.gmra.mrb[4].mxu0 %vm396_vm1, %v580_v58  ;;  %v1645_v58 = vld [vmem:[%s1898_s5 + $0x8] sm:$0xff] }
 0x1e8   : > { %1108 = vmatprep.mubr.f32.mxu0 %v1445_v0 }
 0x2ba   : > { %v649_v60 = vpop.f32.mrb[4].mxu0 }
 0x2bb   : > { %v650_v61 = vadd.f32 %v649_v60, %v577_v59  ;;  %v651_v62 = vpop.f32.mrb[5].mxu0  ;;  %v1650_v60 = vrot.slane %v1637_v56, %v1632_v55 }
 0x2bc   : > { %v652_v63 = vadd.f32 %v651_v62, %v577_v59  ;;  %v1659_v62 = vrot.slane %v1637_v56, %v1640_v57 }
 0x2bd   : > { %v664_v1 = vmul.f32 %v650_v61, %v650_v61 }
 0x2be   : > { %v654_v2 = vadd.f32 %v652_v63, %v650_v61  ;;  %v665_v4 = vmul.f32 %v652_v63, %v652_v63 }
 0x2c0   : > { %655 = vadd.xlane.f32.xlu1 %v654_v2  ;;  %v666_v5 = vadd.f32 %v665_v4, %v664_v1 }
 0x2c2   : > { %667 = vadd.xlane.f32.xlu0 %v666_v5 }
 0x2d1   : > { %692 = vperm.xlu1 %1414, %v1519_v3  }
 0x2d8   : > { %698 = vperm.xlu0 %1415, %v1519_v3  }
 0x2dc   : > { %1416 = vset.pattern.permute.xlu0 %v1463_v49 }
 0x34d   : > { %v656_v0 = vpop.xlane.xlu1 %655 }
 0x34e   : > { %v657_v8 = vrot.slane %v656_v0, 4 }
 0x34f   : > { %v668_v9 = vpop.xlane.xlu0 %667 }
 0x350   : > { %v658_v10 = vadd.f32 %v657_v8, %v656_v0  ;;  %v669_v11 = vrot.slane %v668_v9, 4 }
 0x351   : > { %v693_v39 = vpop.permute.xlu1 %692 }
 0x352   : > { %v659_v12 = vrot.slane %v658_v10, 2  ;;  %v670_v13 = vadd.f32 %v669_v11, %v668_v9 }
 0x354   : > { %v671_v14 = vrot.slane %v670_v13, 2  ;;  %v660_v15 = vadd.f32 %v659_v12, %v658_v10 }
 0x356   : > { %v661_v16 = vrot.slane %v660_v15, 1  ;;  %v672_v17 = vadd.f32 %v671_v14, %v670_v13  ;;  %v750_v14 = vsub.s32 2, %v1627_v52 }
 0x357   : > { %v699_v42 = vpop.permute.xlu0 %698 }
 0x358   : > { %v662_v18 = vadd.f32 %v661_v16, %v660_v15  ;;  %v673_v19 = vrot.slane %v672_v17, 1  ;;  %v767_v15 = vsub.s32 3, %v1627_v52 }
 0x35a   : > { %1360 = vpush %v662_v18  ;;  %v674_v20 = vadd.f32 %v673_v19, %v672_v17  ;;  %v1681_v17 = vrot.slane %v1637_v56, %v750_v14  ;;  %v784_v18 = vsub.s32 5, %v1627_v52 }
 0x35c   : > { %1362 = vpush %v674_v20  ;;  %v1685_v20 = vrot.slane %v1645_v58, %v750_v14 }
 0x38b   : > { %s1361_s18 = spop %1360 }
 0x38c   : > { %s676_s19 = smul.f32 0.001953125, %s1361_s18 }
 0x38d   : > { %s1363_s20 = spop %1362 }
 0x38e   : > { %s678_s23 = smul.f32 %s676_s19, %s676_s19  ;;  %v681_v24 = vstv %s676_s19 }
 0x38f   : > { %s677_s24 = smul.f32 0.001953125, %s1363_s20  ;;  %v682_v27 = vsub.f32 %v650_v61, %v681_v24  ;;  %v683_v35 = vsub.f32 %v652_v63, %v681_v24  ;;  %v1654_v61 = vrot.slane %v1645_v58, %v1632_v55  ;;  %v1663_v63 = vrot.slane %v1645_v58, %v1640_v57 }
 0x391   : > { %s679_s25 = ssub.f32 %s677_s24, %s678_s23 }
 0x393   : > { %s680_s27 = smax.f32 %s1454_s26, %s679_s25 }
 0x394   : > { %s684_s28 = sadd.f32 1e-05, %s680_s27 }
 0x396   : > { %v685_v21 = vstv %s684_s28 }
 0x397   : > { %1423 = vrsqrt.f32 %v685_v21  ;;  %v1689_v21 = vrot.slane %v1637_v56, %v767_v15 }
 0x3a1   : > { %v1424_v22 = vpop.eup %1423 }
 0x3a2   : > { %1364 = vpush %v1424_v22  ;;  %v1692_v22 = vrot.slane %v1645_v58, %v767_v15 }
 0x3d3   : > { %s1365_s29 = spop %1364 }
 0x3d4   : > { %v688_v36 = vstv %s1365_s29 }
 0x3d5   : > { %v689_v40 = vmul.f32 %v688_v36, %v682_v27  ;;  %v690_v41 = vmul.f32 %v688_v36, %v683_v35 }
 0x3d7   : > { %v695_v43 = vmul.f32 %v693_v39, %v689_v40  ;;  %v696_v44 = vmul.f32 %v693_v39, %v690_v41  ;;  %v1704_v40 = vrot.slane %v1637_v56, %v784_v18  ;;  %v1707_v41 = vrot.slane %v1645_v58, %v784_v18 }
 0x3d9   : > { %v701_v45 = vadd.f32 %v699_v42, %v695_v43  ;;  %v702_v46 = vadd.f32 %v699_v42, %v696_v44 }
 0x3db   : > { %v1590_v47 = vmax.f32 %v701_v45, 0.0  ;;  %v1596_v48 = vmax.f32 %v702_v46, 0.0 }
 0x3dd   : > { %775 = vrot.lane.b32.xlu0 %v1590_v47, %s1455_s30  ;;  %705 = vrot.lane.b32.xlu1 %v1590_v47, %s1456_s7 }
 0x3e1   : > { %792 = vrot.lane.b32.xlu0 %v1590_v47, %s1457_s8  ;;  %707 = vrot.lane.b32.xlu1 %v1596_v48, %s1456_s7 }
 0x3e5   : > { %809 = vrot.lane.b32.xlu0 %v1590_v47, %s1458_s9  ;;  %724 = vrot.lane.b32.xlu1 %v1590_v47, %s1459_s10 }
 0x3e9   : > { %826 = vrot.lane.b32.xlu0 %v1590_v47, %s1460_s11  ;;  %726 = vrot.lane.b32.xlu1 %v1596_v48, %s1459_s10 }
 0x3ed   : > { %741 = vrot.lane.b32.xlu1 %v1590_v47, %s1461_s12  ;;  %844 = vperm.xlu0 %1416, %v1519_v3  }
 0x3f1   : > { %743 = vrot.lane.b32.xlu1 %v1596_v48, %s1461_s12 }
 0x3f5   : > { %758 = vrot.lane.b32.xlu1 %v1590_v47, %s1462_s13 }
 0x3f9   : > { %760 = vrot.lane.b32.xlu1 %v1596_v48, %s1462_s13 }
 0x3fd   : > { %777 = vrot.lane.b32.xlu1 %v1596_v48, %s1455_s30 }
 0x401   : > { %794 = vrot.lane.b32.xlu1 %v1596_v48, %s1457_s8 }
 0x405   : > { %811 = vrot.lane.b32.xlu1 %v1596_v48, %s1458_s9 }
 0x409   : > { %828 = vrot.lane.b32.xlu1 %v1596_v48, %s1460_s11 }
 0x44f   : > { %v706_v51 = vpop.permute.xlu1 %705  ;;  %v776_v19 = vpop.permute.xlu0 %775 }
 0x453   : > { %v708_v54 = vpop.permute.xlu1 %707  ;;  %v793_v46 = vpop.permute.xlu0 %792 }
 0x454   : > { %v712_v1 = vsel %vm711_vm2, %v706_v51, %v708_v54  ;;  %v713_v2 = vsel %vm711_vm2, %v708_v54, %v706_v51 }
 0x455   : > { %v722_v7 = vmul.f32 %v1650_v60, %v713_v2  ;;  %v723_v0 = vmul.f32 %v1654_v61, %v712_v1  ;;  %v801_v1 = vsub.s32 6, %v1627_v52 }
 0x457   : > { %v725_v59 = vpop.permute.xlu1 %724 }
 0x45b   : > { %v727_v4 = vpop.permute.xlu1 %726 }
 0x45c   : > { %v729_v5 = vsel %vm728_vm3, %v725_v59, %v727_v4  ;;  %v730_v6 = vsel %vm728_vm3, %v727_v4, %v725_v59 }
 0x45d   : > { %v739_v8 = vmul.f32 %v1659_v62, %v730_v6  ;;  %v740_v9 = vmul.f32 %v1663_v63, %v729_v5  ;;  %v818_v5 = vsub.s32 7, %v1627_v52 }
 0x45f   : > { %v1326_v10 = vpack.c.bf16 %v739_v8, %v722_v7  ;;  %v742_v11 = vpop.permute.xlu1 %741  ;;  %v1324_v12 = vpack.c.bf16 %v740_v9, %v723_v0  ;;  %v1725_v8 = vrot.slane %v1637_v56, %v801_v1  ;;  %v810_v9 = vpop.permute.xlu0 %809  ;;  %v1732_v52 = vrot.slane %v1637_v56, %v818_v5 }
 0x461   : > { %1325 = vmatprep.subr.bf16.mxu1 %v1324_v12 }
 0x462   : > { %1327 = vmatpush1.bf16.msra.mxu1 %v1326_v10  ;;  %v1728_v10 = vrot.slane %v1645_v58, %v801_v1 }
 0x463   : > { %v744_v13 = vpop.permute.xlu1 %743 }
 0x464   : > { %v746_v24 = vsel %vm745_vm4, %v742_v11, %v744_v13  ;;  %v747_v27 = vsel %vm745_vm4, %v744_v13, %v742_v11 }
 0x465   : > { %v756_v42 = vmul.f32 %v1681_v17, %v747_v27  ;;  %v757_v43 = vmul.f32 %v1685_v20, %v746_v24  ;;  %v286_v24 = vld [vmem:[%s1898_s5 + $0x10] sm:$0xff]  ;;  %v827_v27 = vpop.permute.xlu0 %826 }
 0x467   : > { %v759_v16 = vpop.permute.xlu1 %758 }
 0x46b   : > { %v761_v35 = vpop.permute.xlu1 %760 }
 0x46c   : > { %v763_v36 = vsel %vm762_vm5, %v759_v16, %v761_v35  ;;  %v764_v39 = vsel %vm762_vm5, %v761_v35, %v759_v16 }
 0x46d   : > { %v773_v44 = vmul.f32 %v1689_v21, %v764_v39  ;;  %v774_v45 = vmul.f32 %v1692_v22, %v763_v36 }
 0x46f   : > { %v1330_v49 = vpack.c.bf16 %v773_v44, %v756_v42  ;;  %v778_v50 = vpop.permute.xlu1 %777  ;;  %v1328_v51 = vpack.c.bf16 %v774_v45, %v757_v43  ;;  %v1760_v42 = vrot.slane %v286_v24, %v1632_v55 }
 0x470   : > { %v780_v54 = vsel %vm779_vm6, %v776_v19, %v778_v50  ;;  %v781_v59 = vsel %vm779_vm6, %v778_v50, %v776_v19  ;;  %v845_v50 = vpop.permute.xlu0 %844 }
 0x471   : > { %v790_v2 = vmul.f32 %v1704_v40, %v780_v54  ;;  %v791_v4 = vmul.f32 %v1707_v41, %v781_v59  ;;  %1329 = vmatprep.subr.bf16.mxu1 %v1328_v51 }
 0x472   : > { %1331 = vmatpush1.bf16.msra.mxu1 %v1330_v49  ;;  %v290_v49 = vld [vmem:[%s1896_s3] sm:$0xff] }
 0x473   : > { %v1334_v6 = vpack.c.bf16 %v790_v2, %v1590_v47  ;;  %v795_v7 = vpop.permute.xlu1 %794  ;;  %v1332_v0 = vpack.c.bf16 %v791_v4, %v1596_v48  ;;  %v1735_v47 = vrot.slane %v1645_v58, %v818_v5  ;;  %v287_v48 = vld [vmem:[%s1898_s5 + $0x18] sm:$0xff] }
 0x474   : > { %v797_v11 = vsel %vm796_vm7, %v793_v46, %v795_v7  ;;  %v798_v12 = vsel %vm796_vm7, %v795_v7, %v793_v46  ;;  %v1750_v58 = vrot.slane %v287_v48, %v1632_v55  ;;  %v1464_v7 = vmov 6  }
 0x475   : > { %1333 = vmatprep.subr.bf16.mxu1 %v1332_v0  ;;  %v807_v15 = vmul.f32 %v1725_v8, %v797_v11  ;;  %v808_v16 = vmul.f32 %v1728_v10, %v798_v12  ;;  %1417 = vset.pattern.permute.xlu1 %v1464_v7  ;;  %v1465_v0 = vmov 7  }
 0x476   : > { %1335 = vmatpush1.bf16.msra.mxu1 %v1334_v6  ;;  %1418 = vset.pattern.permute.xlu0 %v1465_v0 }
 0x477   : > { %v812_v13 = vpop.permute.xlu1 %811 }
 0x478   : > { %v814_v14 = vsel %vm813_vm8, %v810_v9, %v812_v13  ;;  %v815_v56 = vsel %vm813_vm8, %v812_v13, %v810_v9 }
 0x479   : > { %v824_v18 = vmul.f32 %v1732_v52, %v814_v14  ;;  %v825_v19 = vmul.f32 %v1735_v47, %v815_v56 }
 0x47b   : > { %v1338_v35 = vpack.c.bf16 %v824_v18, %v807_v15  ;;  %v829_v36 = vpop.permute.xlu1 %828  ;;  %v1336_v39 = vpack.c.bf16 %v825_v19, %v808_v16 }
 0x47c   : > { %v832_v43 = vsel %vm830_vm9, %v829_v36, %v827_v27  ;;  %v831_v44 = vsel %vm830_vm9, %v827_v27, %v829_v36 }
 0x47d   : > { %v842_v45 = vmul.f32 %v1750_v58, %v832_v43  ;;  %1337 = vmatprep.subr.bf16.mxu1 %v1336_v39  ;;  %v841_v46 = vmul.f32 %v1760_v42, %v831_v44 }
 0x47e   : > { %1339 = vmatpush1.bf16.msra.mxu1 %v1338_v35 }
 0x47f   : > { %867 = vmatprep.subr.mxu1 %v842_v45 }
 0x482   : > { %868 = vmatpush1.msra.mxu1 %v841_v46 }
 0x483   : > { %1295 = vmatmul.mubr.msk.f32.vlgmr.msra.gmra.mrb[4].mxu1 %vm847_vm10, %v290_v49 }
 0x556   : > { %v917_v51 = vpop.f32.mrb[4].mxu1 }
 0x557   : > { %v918_v54 = vadd.f32 %v917_v51, %v845_v50  ;;  %v919_v59 = vpop.f32.mrb[5].mxu1 }
 0x558   : > { %v920_v1 = vadd.f32 %v919_v59, %v845_v50 }
 0x559   : > { %v932_v2 = vmul.f32 %v918_v54, %v918_v54 }
 0x55a   : > { %v922_v4 = vadd.f32 %v920_v1, %v918_v54  ;;  %v933_v5 = vmul.f32 %v920_v1, %v920_v1 }
 0x55c   : > { %923 = vadd.xlane.f32.xlu1 %v922_v4  ;;  %v934_v6 = vadd.f32 %v933_v5, %v932_v2 }
 0x55e   : > { %935 = vadd.xlane.f32.xlu0 %v934_v6 }
 0x56d   : > { %960 = vperm.xlu1 %1417, %v1519_v3  }
 0x574   : > { %966 = vperm.xlu0 %1418, %v1519_v3  }
 0x5e9   : > { %v924_v9 = vpop.xlane.xlu1 %923 }
 0x5ea   : > { %v925_v48 = vrot.slane %v924_v9, 4 }
 0x5eb   : > { %v936_v11 = vpop.xlane.xlu0 %935 }
 0x5ec   : > { %v926_v12 = vadd.f32 %v925_v48, %v924_v9  ;;  %v937_v13 = vrot.slane %v936_v11, 4 }
 0x5ed   : > { %v961_v49 = vpop.permute.xlu1 %960 }
 0x5ee   : > { %v927_v14 = vrot.slane %v926_v12, 2  ;;  %v938_v56 = vadd.f32 %v937_v13, %v936_v11 }
 0x5f0   : > { %v939_v15 = vrot.slane %v938_v56, 2  ;;  %v928_v16 = vadd.f32 %v927_v14, %v926_v12 }
 0x5f2   : > { %v929_v18 = vrot.slane %v928_v16, 1  ;;  %v940_v19 = vadd.f32 %v939_v15, %v938_v56 }
 0x5f3   : > { %v967_v59 = vpop.permute.xlu0 %966 }
 0x5f4   : > { %v930_v24 = vadd.f32 %v929_v18, %v928_v16  ;;  %v941_v27 = vrot.slane %v940_v19, 1 }
 0x5f6   : > { %1366 = vpush %v930_v24  ;;  %v942_v35 = vadd.f32 %v941_v27, %v940_v19 }
 0x5f8   : > { %1368 = vpush %v942_v35 }
 0x627   : > { %s1367_s28 = spop %1366 }
 0x628   : > { %s944_s29 = smul.f32 0.001953125, %s1367_s28 }
 0x629   : > { %s1369_s15 = spop %1368 }
 0x62a   : > { %s946_s16 = smul.f32 %s944_s29, %s944_s29  ;;  %v949_v43 = vstv %s944_s29  ;;  %s271_s29 = scalar_lea.vmem %s1899_s6, %s1301_s14 }
 0x62b   : > { %s945_s17 = smul.f32 0.001953125, %s1369_s15  ;;  %v950_v44 = vsub.f32 %v918_v54, %v949_v43  ;;  %v951_v45 = vsub.f32 %v920_v1, %v949_v43  ;;  %v1466_v54 = vmov 8  }
 0x62c   : > { %1419 = vset.pattern.permute.xlu1 %v1466_v54 }
 0x62d   : > { %s947_s18 = ssub.f32 %s945_s17, %s946_s16 }
 0x62f   : > { %s948_s19 = smax.f32 %s1454_s26, %s947_s18 }
 0x630   : > { %s952_s20 = sadd.f32 1e-05, %s948_s19 }
 0x632   : > { %v953_v36 = vstv %s952_s20 }
 0x633   : > { %1425 = vrsqrt.f32 %v953_v36 }
 0x63d   : > { %v1426_v39 = vpop.eup %1425 }
 0x63e   : > { %1370 = vpush %v1426_v39 }
 0x66f   : > { %s1371_s23 = spop %1370 }
 0x670   : > { %v956_v46 = vstv %s1371_s23 }
 0x671   : > { %v957_v50 = vmul.f32 %v956_v46, %v950_v44  ;;  %v958_v51 = vmul.f32 %v956_v46, %v951_v45 }
 0x673   : > { %v963_v2 = vmul.f32 %v961_v49, %v957_v50  ;;  %v964_v4 = vmul.f32 %v961_v49, %v958_v51 }
 0x675   : > { %v969_v5 = vadd.f32 %v967_v59, %v963_v2  ;;  %v970_v6 = vadd.f32 %v967_v59, %v964_v4 }
 0x677   : > { %v1775_v7 = vmax.f32 %v969_v5, 0.0  ;;  %v1777_v0 = vmax.f32 %v970_v6, 0.0 }
 0x679   : > { %999 = vrot.lane.b32.xlu0 %v1777_v0, %s1462_s13  ;;  %973 = vrot.lane.b32.xlu1 %v1775_v7, %s1456_s7 }
 0x67d   : > { %1007 = vrot.lane.b32.xlu0 %v1777_v0, %s1455_s30  ;;  %975 = vrot.lane.b32.xlu1 %v1777_v0, %s1456_s7 }
 0x681   : > { %1015 = vrot.lane.b32.xlu0 %v1777_v0, %s1457_s8  ;;  %981 = vrot.lane.b32.xlu1 %v1775_v7, %s1459_s10 }
 0x685   : > { %1023 = vrot.lane.b32.xlu0 %v1777_v0, %s1458_s9  ;;  %983 = vrot.lane.b32.xlu1 %v1777_v0, %s1459_s10 }
 0x689   : > { %1031 = vrot.lane.b32.xlu0 %v1777_v0, %s1460_s11  ;;  %989 = vrot.lane.b32.xlu1 %v1775_v7, %s1461_s12 }
 0x68d   : > { %991 = vrot.lane.b32.xlu1 %v1777_v0, %s1461_s12 }
 0x691   : > { %997 = vrot.lane.b32.xlu1 %v1775_v7, %s1462_s13 }
 0x695   : > { %1005 = vrot.lane.b32.xlu1 %v1775_v7, %s1455_s30 }
 0x699   : > { %1013 = vrot.lane.b32.xlu1 %v1775_v7, %s1457_s8 }
 0x69d   : > { %1021 = vrot.lane.b32.xlu1 %v1775_v7, %s1458_s9 }
 0x6a1   : > { %1029 = vrot.lane.b32.xlu1 %v1775_v7, %s1460_s11 }
 0x6a5   : > { %1038 = vperm.xlu1 %1419, %v1519_v3  }
 0x6eb   : > { %v974_v1 = vpop.permute.xlu1 %973  ;;  %v1000_v24 = vpop.permute.xlu0 %999 }
 0x6ef   : > { %v976_v9 = vpop.permute.xlu1 %975  ;;  %v1008_v43 = vpop.permute.xlu0 %1007 }
 0x6f0   : > { %v977_v11 = vsel %vm711_vm2, %v974_v1, %v976_v9  ;;  %v978_v12 = vsel %vm711_vm2, %v976_v9, %v974_v1 }
 0x6f1   : > { %v979_v15 = vmul.f32 %v978_v12, %v1650_v60  ;;  %v980_v16 = vmul.f32 %v977_v11, %v1654_v61 }
 0x6f3   : > { %v982_v48 = vpop.permute.xlu1 %981  ;;  %v1016_v51 = vpop.permute.xlu0 %1015 }
 0x6f7   : > { %v984_v13 = vpop.permute.xlu1 %983  ;;  %v1024_v1 = vpop.permute.xlu0 %1023 }
 0x6f8   : > { %v985_v14 = vsel %vm728_vm3, %v982_v48, %v984_v13  ;;  %v986_v56 = vsel %vm728_vm3, %v984_v13, %v982_v48 }
 0x6f9   : > { %v987_v18 = vmul.f32 %v986_v56, %v1659_v62  ;;  %v988_v19 = vmul.f32 %v985_v14, %v1663_v63 }
 0x6fb   : > { %v1342_v27 = vpack.c.bf16 %v987_v18, %v979_v15  ;;  %v990_v35 = vpop.permute.xlu1 %989  ;;  %v1340_v36 = vpack.c.bf16 %v988_v19, %v980_v16  ;;  %v1032_v14 = vpop.permute.xlu0 %1031 }
 0x6fd   : > { %1341 = vmatprep.subr.bf16.mxu0 %v1340_v36 }
 0x6fe   : > { %1343 = vmatpush1.bf16.msra.mxu0 %v1342_v27 }
 0x6ff   : > { %v992_v39 = vpop.permute.xlu1 %991 }
 0x700   : > { %v993_v44 = vsel %vm745_vm4, %v990_v35, %v992_v39  ;;  %v994_v60 = vsel %vm745_vm4, %v992_v39, %v990_v35 }
 0x701   : > { %v995_v63 = vmul.f32 %v994_v60, %v1681_v17  ;;  %v996_v46 = vmul.f32 %v993_v44, %v1685_v20  ;;  %v1467_v44 = vmov 9  }
 0x702   : > { %1420 = vset.pattern.permute.xlu0 %v1467_v44 }
 0x703   : > { %v998_v45 = vpop.permute.xlu1 %997 }
 0x704   : > { %v1001_v61 = vsel %vm762_vm5, %v998_v45, %v1000_v24  ;;  %v1002_v62 = vsel %vm762_vm5, %v1000_v24, %v998_v45 }
 0x705   : > { %v1003_v49 = vmul.f32 %v1002_v62, %v1689_v21  ;;  %v1004_v50 = vmul.f32 %v1001_v61, %v1692_v22 }
 0x707   : > { %v1346_v59 = vpack.c.bf16 %v1003_v49, %v995_v63  ;;  %v1006_v2 = vpop.permute.xlu1 %1005  ;;  %v1344_v4 = vpack.c.bf16 %v1004_v50, %v996_v46 }
 0x708   : > { %v1009_v5 = vsel %vm779_vm6, %v1006_v2, %v1008_v43  ;;  %v1010_v6 = vsel %vm779_vm6, %v1008_v43, %v1006_v2 }
 0x709   : > { %v1011_v54 = vmul.f32 %v1009_v5, %v1704_v40  ;;  %v1012_v17 = vmul.f32 %v1010_v6, %v1707_v41  ;;  %1345 = vmatprep.subr.bf16.mxu0 %v1344_v4 }
 0x70a   : > { %1347 = vmatpush1.bf16.msra.mxu0 %v1346_v59 }
 0x70b   : > { %v1350_v20 = vpack.c.bf16 %v1011_v54, %v1775_v7  ;;  %v1014_v21 = vpop.permute.xlu1 %1013  ;;  %v1348_v22 = vpack.c.bf16 %v1012_v17, %v1777_v0 }
 0x70c   : > { %v1017_v9 = vsel %vm796_vm7, %v1014_v21, %v1016_v51  ;;  %v1018_v48 = vsel %vm796_vm7, %v1016_v51, %v1014_v21 }
 0x70d   : > { %1349 = vmatprep.subr.bf16.mxu0 %v1348_v22  ;;  %v1019_v7 = vmul.f32 %v1017_v9, %v1725_v8  ;;  %v1020_v0 = vmul.f32 %v1018_v48, %v1728_v10  ;;  %v291_v10 = vld [vmem:[%s1896_s3 + $0x8] sm:$0xff] }
 0x70e   : > { %1351 = vmatpush1.bf16.msra.mxu0 %v1350_v20 }
 0x70f   : > { %v1022_v11 = vpop.permute.xlu1 %1021 }
 0x710   : > { %v1025_v40 = vsel %vm813_vm8, %v1022_v11, %v1024_v1  ;;  %v1026_v41 = vsel %vm813_vm8, %v1024_v1, %v1022_v11 }
 0x711   : > { %v1027_v12 = vmul.f32 %v1025_v40, %v1732_v52  ;;  %v1028_v13 = vmul.f32 %v1026_v41, %v1735_v47 }
 0x713   : > { %v1354_v56 = vpack.c.bf16 %v1027_v12, %v1019_v7  ;;  %v1030_v15 = vpop.permute.xlu1 %1029  ;;  %v1352_v16 = vpack.c.bf16 %v1028_v13, %v1020_v0 }
 0x714   : > { %v1034_v18 = vsel %vm830_vm9, %v1032_v14, %v1030_v15  ;;  %v1033_v19 = vsel %vm830_vm9, %v1030_v15, %v1032_v14 }
 0x715   : > { %v1036_v24 = vmul.f32 %v1034_v18, %v1750_v58  ;;  %1353 = vmatprep.subr.bf16.mxu0 %v1352_v16  ;;  %v1035_v8 = vmul.f32 %v1033_v19, %v1760_v42  ;;  %v1468_v42 = vmov 10  }
 0x716   : > { %1355 = vmatpush1.bf16.msra.mxu0 %v1354_v56  ;;  %1421 = vset.pattern.permute.xlu1 %v1468_v42 }
 0x717   : > { %1060 = vmatprep.subr.mxu0 %v1036_v24 }
 0x71a   : > { %1061 = vmatpush1.msra.mxu0 %v1035_v8 }
 0x71b   : > { %1296 = vmatmul.mubr.msk.f32.vlgmr.msra.gmra.mrb[6].mxu0 %vm847_vm10, %v291_v10 }
 0x724   : > { %v1039_v52 = vpop.permute.xlu1 %1038 }
 0x7ee   : > { %v1110_v47 = vpop.f32.mrb[6].mxu0 }
 0x7ef   : > { %v1112_v27 = vpop.f32.mrb[7].mxu0  ;;  %v1111_v35 = vadd.f32 %v1110_v47, %v1039_v52 }
 0x7f0   : > { %v1113_v53 = vadd.f32 %v1112_v27, %v1039_v52 }
 0x7f1   : > { %v1125_v36 = vmul.f32 %v1111_v35, %v1111_v35 }
 0x7f2   : > { %v1115_v39 = vadd.f32 %v1113_v53, %v1111_v35  ;;  %v1126_v58 = vmul.f32 %v1113_v53, %v1113_v53 }
 0x7f4   : > { %1116 = vadd.xlane.f32.xlu0 %v1115_v39  ;;  %v1127_v43 = vadd.f32 %v1126_v58, %v1125_v36 }
 0x7f6   : > { %1128 = vadd.xlane.f32.xlu1 %v1127_v43 }
 0x807   : > { %1159 = vperm.xlu1 %1421, %v1519_v3  }
 0x80a   : > { %1153 = vperm.xlu0 %1420, %v1519_v3  }
 0x80e   : > { %1422 = vset.pattern.permute.xlu0 %v1468_v42 }
 0x881   : > { %v1117_v60 = vpop.xlane.xlu0 %1116 }
 0x882   : > { %v1118_v45 = vrot.slane %v1117_v60, 4 }
 0x883   : > { %v1129_v61 = vpop.xlane.xlu1 %1128 }
 0x884   : > { %v1119_v62 = vadd.f32 %v1118_v45, %v1117_v60  ;;  %v1130_v63 = vrot.slane %v1129_v61, 4 }
 0x886   : > { %v1120_v46 = vrot.slane %v1119_v62, 2  ;;  %v1131_v49 = vadd.f32 %v1130_v63, %v1129_v61 }
 0x887   : > { %v1160_v11 = vpop.permute.xlu1 %1159 }
 0x888   : > { %v1132_v50 = vrot.slane %v1131_v49, 2  ;;  %v1121_v51 = vadd.f32 %v1120_v46, %v1119_v62 }
 0x889   : > { %v1154_v1 = vpop.permute.xlu0 %1153 }
 0x88a   : > { %v1122_v59 = vrot.slane %v1121_v51, 1  ;;  %v1133_v2 = vadd.f32 %v1132_v50, %v1131_v49 }
 0x88c   : > { %v1123_v4 = vadd.f32 %v1122_v59, %v1121_v51  ;;  %v1134_v5 = vrot.slane %v1133_v2, 1 }
 0x88e   : > { %1372 = vpush %v1123_v4  ;;  %v1135_v6 = vadd.f32 %v1134_v5, %v1133_v2 }
 0x890   : > { %1374 = vpush %v1135_v6 }
 0x8bf   : > { %s1373_s8 = spop %1372 }
 0x8c0   : > { %s1137_s9 = smul.f32 0.001953125, %s1373_s8 }
 0x8c1   : > { %s1375_s10 = spop %1374 }
 0x8c2   : > { %s1139_s11 = smul.f32 %s1137_s9, %s1137_s9  ;;  %v1142_v17 = vstv %s1137_s9 }
 0x8c3   : > { %s1138_s12 = smul.f32 0.001953125, %s1375_s10  ;;  %v1143_v20 = vsub.f32 %v1111_v35, %v1142_v17  ;;  %v1144_v21 = vsub.f32 %v1113_v53, %v1142_v17 }
 0x8c5   : > { %s1140_s13 = ssub.f32 %s1138_s12, %s1139_s11 }
 0x8c7   : > { %s1141_s24 = smax.f32 %s1454_s26, %s1140_s13 }
 0x8c8   : > { %s1145_s25 = sadd.f32 1e-05, %s1141_s24 }
 0x8ca   : > { %v1146_v3 = vstv %s1145_s25 }
 0x8cb   : > { %1427 = vrsqrt.f32 %v1146_v3 }
 0x8d5   : > { %v1428_v54 = vpop.eup %1427 }
 0x8d6   : > { %1376 = vpush %v1428_v54 }
 0x907   : > { %s1377_s27 = spop %1376 }
 0x908   : > { %v1149_v22 = vstv %s1377_s27 }
 0x909   : > { %v1150_v9 = vmul.f32 %v1149_v22, %v1143_v20  ;;  %v1151_v48 = vmul.f32 %v1149_v22, %v1144_v21 }
 0x90b   : > { %v1156_v40 = vmul.f32 %v1154_v1, %v1150_v9  ;;  %v1157_v41 = vmul.f32 %v1154_v1, %v1151_v48 }
 0x90d   : > { %v1162_v7 = vadd.f32 %v1160_v11, %v1156_v40  ;;  %v1163_v0 = vadd.f32 %v1160_v11, %v1157_v41 }
 0x90f   : > { %v1164_v12 = vmax.f32 %v1162_v7, 0.0  ;;  %v1165_v13 = vmax.f32 %v1163_v0, 0.0 }
 0x911   : > { %v1297_v14 = vmul.f32 -1.442695, %v1164_v12  ;;  %v1298_v56 = vmul.f32 -1.442695, %v1165_v13 }
 0x913   : > { %1429 = vpow2.f32 %v1297_v14 }
 0x914   : > { %1431 = vpow2.f32 %v1298_v56 }
 0x91d   : > { %v1430_v15 = vpop.eup %1429 }
 0x91e   : > { %v1432_v16 = vpop.eup %1431  ;;  %v1172_v18 = vadd.f32 1.0, %v1430_v15 }
 0x91f   : > { %v1173_v19 = vadd.f32 1.0, %v1432_v16 }
 0x920   : > { %1433 = vrcp.f32 %v1172_v18 }
 0x921   : > { %1435 = vrcp.f32 %v1173_v19 }
 0x92a   : > { %v1434_v24 = vpop.eup %1433 }
 0x92b   : > { %v1436_v8 = vpop.eup %1435  ;;  %v1181_v10 = vrot.slane %v1434_v24, %v1632_v55  ;;  %v1193_v52 = vrot.slane %v1434_v24, %v1640_v57 }
 0x92c   : > { %v1185_v47 = vrot.slane %v1436_v8, %v1632_v55  ;;  %v1197_v27 = vrot.slane %v1436_v8, %v1640_v57 }
 0x92d   : > { %v1186_v35 = vmul.f32 %v1181_v10, %v1566_v37  ;;  %v1188_v53 = vmul.f32 %v1181_v10, %v1568_v38  ;;  %v1198_v36 = vmul.f32 %v1193_v52, %v388_v34  ;;  %v1200_v39 = vmul.f32 %v1193_v52, %v390_v29 }
 0x92e   : > { %v1187_v58 = vmul.f32 %v1185_v47, %v1553_v30  ;;  %v1189_v55 = vmul.f32 %v1185_v47, %v1555_v31  ;;  %v1199_v37 = vmul.f32 %v1197_v27, %v389_v32  ;;  %v1201_v38 = vmul.f32 %v1197_v27, %v391_v33 }
 0x92f   : > { %v1202_v25 = vadd.f32 %v1198_v36, %v1186_v35  ;;  %v1204_v34 = vadd.f32 %v1200_v39, %v1188_v53 }
 0x930   : > { %v1203_v57 = vadd.f32 %v1199_v37, %v1187_v58  ;;  %v1205_v26 = vadd.f32 %v1201_v38, %v1189_v55 }
 0x931   : > { %1206 = vst [vmem:[%s271_s29] sm:$0xff] %v1202_v25  ;;  %1208 = vst [vmem:[%s271_s29 + $0x10] sm:$0xff] %v1204_v34 }
 0x932   : > { %1207 = vst [vmem:[%s271_s29 + $0x8] sm:$0xff] %v1203_v57  ;;  %1209 = vst [vmem:[%s271_s29 + $0x18] sm:$0xff] %v1205_v26 }
 0x933 PF: > { %s16_s21 = sadd.s32 1, %s1443_s21  }
 0x934   : > { %p13_p4 = scmp.ge.s32.totalorder %s16_s21, 4  }
 0x936   :  { %15 = sbr.rel (!%p13_p4) target bundleno = 1 (0x1), region = 77 }

</bundles_post_ra>
